<compile_context>
chip_gen: v6e
topology: v6e:2x2x1
jax: 0.10.0
libtpu: 0.0.40
codegen_flags: <defaults>
</compile_context>

<pallas_src>
import functools

import jax
import jax.numpy as jnp
from jax.experimental import pallas as pl
from jax.experimental.pallas import tpu as pltpu


def _se_block_kernel(x_ref, w1t_ref, w2t_ref, o_ref, *, inv_hw):
    # x_ref : (Bt, C, HW)  tile of Bt batch elements, spatial flattened
    # w1t_ref: (C, hidden) first Linear weight, transposed (w1.T)
    # w2t_ref: (hidden, C) second Linear weight, transposed (w2.T)
    # o_ref : (Bt, C, HW)
    x = x_ref[...]  # keep native dtype; no full-tile upcast

    # Squeeze: global average pool with f32 accumulation, scaled by 1/true_HW.
    pooled = jnp.sum(x, axis=-1, dtype=jnp.float32) * inv_hw          # (Bt, C)

    # Excitation: Linear -> ReLU -> Linear -> Sigmoid (bias=False, as in the
    # PyTorch module), expressed as row matmuls on the MXU with f32 accum.
    h = jnp.dot(pooled, w1t_ref[...], preferred_element_type=jnp.float32)
    h = jnp.maximum(h, 0.0)                                           # (Bt, hid)
    s = jnp.dot(h, w2t_ref[...], preferred_element_type=jnp.float32)
    s = jax.nn.sigmoid(s)                                             # (Bt, C)

    # Scale: broadcast the channel gate over the spatial lanes.
    o_ref[...] = (x * s[:, :, None].astype(x.dtype)).astype(o_ref.dtype)


def _chip_hints():
    """Best-effort chip detection -> is_v7x_like (64 MiB VMEM / 2 TCs)."""
    is_v7x = False
    try:
        info = pltpu.get_tpu_info()
        vmem = int(getattr(info, "vmem_capacity_bytes", 128 << 20))
        is_v7x = vmem <= (64 << 20)
    except Exception:
        pass
    try:
        kind = jax.devices()[0].device_kind.lower()
        if "v7" in kind or "7x" in kind:
            is_v7x = True
    except Exception:
        pass
    return is_v7x


def se_block(x, w1, w2):
    """SE block forward. x: (B, C, H, W); w1: (hidden, C); w2: (C, hidden)."""
    B, C, H, W = x.shape
    hidden = w1.shape[0]
    HW = H * W

    # Free, layout-preserving reshape (no extra HBM pass, unlike padding).
    x_flat = x.reshape(B, C, HW)
    # TODO(synk): for small-spatial / large-channel stages (e.g. 7x7, C>=512) a
    # channel-in-lane (Bt, HW, C) block layout would give fully lane-dense
    # stores; here we simply keep the unpadded HW in lanes (no wasted HBM BW).

    itemsize = x.dtype.itemsize
    bytes_per_sample = C * HW * itemsize
    w_bytes = (w1.size + w2.size) * w1.dtype.itemsize

    is_v7x = _chip_hints()

    # Batch-tile sizing: big DMA blocks (amortize ~0.35us/step overhead) while
    # 2 input + 2 output pipeline buffers stay inside scoped VMEM everywhere.
    target_block_bytes = (10 << 20) if is_v7x else (8 << 20)
    Bt = max(1, min(B, target_block_bytes // max(1, bytes_per_sample)))

    if is_v7x and B >= 2:
        # Two TensorCores: prefer an even number of grid steps for balance.
        steps = -(-B // Bt)
        if steps % 2 == 1:
            new_bt = max(1, -(-B // (steps + 1)))
            if (-(-B // new_bt)) % 2 == 0:
                Bt = new_bt
    num_steps = -(-B // Bt)

    block_bytes = Bt * bytes_per_sample
    want = 4 * block_bytes + 4 * w_bytes + (4 << 20)
    cap = (52 << 20) if is_v7x else (96 << 20)
    vmem_limit = int(min(max(want, 32 << 20), cap))

    kernel = functools.partial(_se_block_kernel, inv_hw=1.0 / HW)

    cost = pl.CostEstimate(
        flops=int(2 * B * C * hidden * 2 + 2 * B * C * HW),
        transcendentals=int(B * C),
        bytes_accessed=int(2 * B * C * HW * itemsize + 2 * w_bytes),
    )

    def _make_call(buffer_weights):
        if buffer_weights:
            w_specs = [
                pl.BlockSpec((C, hidden), lambda b: (0, 0),
                             pipeline_mode=pl.Buffered(1)),
                pl.BlockSpec((hidden, C), lambda b: (0, 0),
                             pipeline_mode=pl.Buffered(1)),
            ]
        else:
            w_specs = [
                pl.BlockSpec((C, hidden), lambda b: (0, 0)),
                pl.BlockSpec((hidden, C), lambda b: (0, 0)),
            ]
        return pl.pallas_call(
            kernel,
            out_shape=jax.ShapeDtypeStruct((B, C, HW), x.dtype),
            grid_spec=pltpu.PrefetchScalarGridSpec(
                num_scalar_prefetch=0,
                grid=(num_steps,),
                in_specs=[pl.BlockSpec((Bt, C, HW), lambda b: (b, 0, 0))] + w_specs,
                out_specs=pl.BlockSpec((Bt, C, HW), lambda b: (b, 0, 0)),
            ),
            compiler_params=pltpu.CompilerParams(
                dimension_semantics=("parallel",),
                vmem_limit_bytes=vmem_limit,
            ),
            cost_estimate=cost,
        )

    w1t = w1.T  # tiny weight transposes; negligible
    w2t = w2.T
    try:
        out_flat = _make_call(True)(x_flat, w1t, w2t)
    except Exception:
        # Installed Pallas may not accept pipeline_mode / Buffered(1); falling
        # back to default double-buffered weights costs only a few KiB here.
        out_flat = _make_call(False)(x_flat, w1t, w2t)

    return out_flat.reshape(B, C, H, W)  # free reshape, no slicing pass


def se_block_ref(x, w1, w2):
    """Pure-JAX reference mirroring the PyTorch module (bias-free Linears)."""
    y = jnp.mean(x, axis=(2, 3))                  # AdaptiveAvgPool2d(1)
    y = jnp.maximum(y @ w1.T, 0.0)                # Linear + ReLU
    y = jax.nn.sigmoid(y @ w2.T)                  # Linear + Sigmoid
    return x * y[:, :, None, None]


if __name__ == "__main__":
    B, C, H, W = 2, 32, 16, 16
    reduction = 16
    hidden = C // reduction                       # = 2

    key = jax.random.PRNGKey(0)
    kx, kw1, kw2 = jax.random.split(key, 3)
    x = jax.random.normal(kx, (B, C, H, W), dtype=jnp.float32)
    # Deterministic synthetic weights (Kaiming-like scale).
    w1 = jax.random.normal(kw1, (hidden, C), dtype=jnp.float32) * (1.0 / C) ** 0.5
    w2 = jax.random.normal(kw2, (C, hidden), dtype=jnp.float32) * (1.0 / hidden) ** 0.5

    out = jax.block_until_ready(se_block(x, w1, w2))
    ref = se_block_ref(x, w1, w2)
    assert out.shape == (B, C, H, W)
    assert jnp.allclose(out, ref, atol=1e-5, rtol=1e-5), "mismatch vs reference"
    print("KERNEL_OK")
</pallas_src>

<mosaic_0001>
module attributes {stable_mosaic.version = 11 : i64} {
  func.func @_se_block_kernel(%arg0: i32, %arg1: memref<2x32x256xf32, #tpu.memory_space<vmem>>, %arg2: memref<32x2xf32, #tpu.memory_space<vmem>>, %arg3: memref<2x32xf32, #tpu.memory_space<vmem>>, %arg4: memref<2x32x256xf32, #tpu.memory_space<vmem>>) attributes {dimension_semantics = [#tpu.dimension_semantics<parallel>], iteration_bounds = array<i64: 1>, scalar_prefetch = 0 : i64, scratch_operands = 0 : i64, tpu.core_type = #tpu.core_type<tc>, window_params = [{transform_indices = @transform_0, window_bounds = array<i64: 2, 32, 256>}, {pipeline_mode = #tpu.pipeline_mode<synchronous>, transform_indices = @transform_1, window_bounds = array<i64: 32, 2>}, {pipeline_mode = #tpu.pipeline_mode<synchronous>, transform_indices = @transform_2, window_bounds = array<i64: 2, 32>}, {transform_indices = @transform_3, window_bounds = array<i64: 2, 32, 256>}]} {
    %c0 = arith.constant 0 : index
    %c0_0 = arith.constant 0 : index
    %c0_1 = arith.constant 0 : index
    %0 = vector.load %arg1[%c0, %c0_0, %c0_1] : memref<2x32x256xf32, #tpu.memory_space<vmem>>, vector<2x32x256xf32>
    %cst = arith.constant dense<0.000000e+00> : vector<2x32xf32>
    %1 = vector.multi_reduction <add>, %0, %cst [2] : vector<2x32x256xf32> to vector<2x32xf32>
    %cst_2 = arith.constant 3.906250e-03 : f32
    %2 = vector.broadcast %cst_2 : f32 to vector<2x32xf32>
    %3 = arith.mulf %1, %2 : vector<2x32xf32>
    %c0_3 = arith.constant 0 : index
    %c0_4 = arith.constant 0 : index
    %4 = vector.load %arg2[%c0_3, %c0_4] : memref<32x2xf32, #tpu.memory_space<vmem>>, vector<32x2xf32>
    %cst_5 = arith.constant dense<0.000000e+00> : vector<2x2xf32>
    %5 = tpu.matmul %3, %4, %cst_5 {dimension_numbers = #tpu.dot_dimension_numbers<[1], [0], [0], [1], [0, 0, 1, 1], [], []>} : vector<2x32xf32>, vector<32x2xf32>, vector<2x2xf32> -> vector<2x2xf32>
    %cst_6 = arith.constant 0.000000e+00 : f32
    %6 = vector.broadcast %cst_6 : f32 to vector<2x2xf32>
    %7 = arith.maximumf %5, %6 : vector<2x2xf32>
    %c0_7 = arith.constant 0 : index
    %c0_8 = arith.constant 0 : index
    %8 = vector.load %arg3[%c0_7, %c0_8] : memref<2x32xf32, #tpu.memory_space<vmem>>, vector<2x32xf32>
    %cst_9 = arith.constant dense<0.000000e+00> : vector<2x32xf32>
    %9 = tpu.matmul %7, %8, %cst_9 {dimension_numbers = #tpu.dot_dimension_numbers<[1], [0], [0], [1], [0, 0, 1, 1], [], []>} : vector<2x2xf32>, vector<2x32xf32>, vector<2x32xf32> -> vector<2x32xf32>
    %10 = arith.negf %9 : vector<2x32xf32>
    %11 = math.exp %10 : vector<2x32xf32>
    %cst_10 = arith.constant 1.000000e+00 : f32
    %12 = vector.broadcast %cst_10 : f32 to vector<2x32xf32>
    %13 = arith.addf %12, %11 : vector<2x32xf32>
    %14 = arith.divf %12, %13 : vector<2x32xf32>
    %15 = vector.shape_cast %14 : vector<2x32xf32> to vector<2x32x1xf32>
    %16 = vector.broadcast %15 : vector<2x32x1xf32> to vector<2x32x256xf32>
    %17 = arith.mulf %0, %16 : vector<2x32x256xf32>
    %c0_11 = arith.constant 0 : index
    %c0_12 = arith.constant 0 : index
    %c0_13 = arith.constant 0 : index
    %18 = vector.load %arg4[%c0_11, %c0_12, %c0_13] : memref<2x32x256xf32, #tpu.memory_space<vmem>>, vector<2x32x256xf32>
    tpu.vector_store %arg4[%c0_11, %c0_12, %c0_13], %17 {strides = array<i32>} : memref<2x32x256xf32, #tpu.memory_space<vmem>>, vector<2x32x256xf32>,
    return
  }
  func.func @transform_0(%arg0: i32) -> (i32, i32, i32) {
    %c0_i32 = arith.constant 0 : i32
    %c0_i32_0 = arith.constant 0 : i32
    %c0_i32_1 = arith.constant 0 : i32
    return %arg0, %c0_i32, %c0_i32_0 : i32, i32, i32
  }
  func.func @transform_1(%arg0: i32) -> (i32, i32) {
    %c0_i32 = arith.constant 0 : i32
    %c0_i32_0 = arith.constant 0 : i32
    %c0_i32_1 = arith.constant 0 : i32
    return %c0_i32, %c0_i32_0 : i32, i32
  }
  func.func @transform_2(%arg0: i32) -> (i32, i32) {
    %c0_i32 = arith.constant 0 : i32
    %c0_i32_0 = arith.constant 0 : i32
    %c0_i32_1 = arith.constant 0 : i32
    return %c0_i32, %c0_i32_0 : i32, i32
  }
  func.func @transform_3(%arg0: i32) -> (i32, i32, i32) {
    %c0_i32 = arith.constant 0 : i32
    %c0_i32_0 = arith.constant 0 : i32
    %c0_i32_1 = arith.constant 0 : i32
    return %arg0, %c0_i32, %c0_i32_0 : i32, i32, i32
  }
}

module attributes {stable_mosaic.version = 11 : i64} {
  func.func @_se_block_kernel(%arg0: i32, %arg1: memref<2x32x256xf32, #tpu.memory_space<vmem>>, %arg2: memref<32x2xf32, #tpu.memory_space<vmem>>, %arg3: memref<2x32xf32, #tpu.memory_space<vmem>>, %arg4: memref<2x32x256xf32, #tpu.memory_space<vmem>>) attributes {dimension_semantics = [#tpu.dimension_semantics<parallel>], iteration_bounds = array<i64: 1>, scalar_prefetch = 0 : i64, scratch_operands = 0 : i64, tpu.core_type = #tpu.core_type<tc>, window_params = [{transform_indices = @transform_0, window_bounds = array<i64: 2, 32, 256>}, {pipeline_mode = #tpu.pipeline_mode<synchronous>, transform_indices = @transform_1, window_bounds = array<i64: 32, 2>}, {pipeline_mode = #tpu.pipeline_mode<synchronous>, transform_indices = @transform_2, window_bounds = array<i64: 2, 32>}, {transform_indices = @transform_3, window_bounds = array<i64: 2, 32, 256>}]} {
    %c0 = arith.constant 0 : index
    %c0_0 = arith.constant 0 : index
    %c0_1 = arith.constant 0 : index
    %0 = vector.load %arg1[%c0, %c0_0, %c0_1] : memref<2x32x256xf32, #tpu.memory_space<vmem>>, vector<2x32x256xf32>
    %cst = arith.constant dense<0.000000e+00> : vector<2x32xf32>
    %1 = vector.multi_reduction <add>, %0, %cst [2] : vector<2x32x256xf32> to vector<2x32xf32>
    %cst_2 = arith.constant 3.906250e-03 : f32
    %2 = vector.broadcast %cst_2 : f32 to vector<2x32xf32>
    %3 = arith.mulf %1, %2 : vector<2x32xf32>
    %c0_3 = arith.constant 0 : index
    %c0_4 = arith.constant 0 : index
    %4 = vector.load %arg2[%c0_3, %c0_4] : memref<32x2xf32, #tpu.memory_space<vmem>>, vector<32x2xf32>
    %cst_5 = arith.constant dense<0.000000e+00> : vector<2x2xf32>
    %5 = tpu.matmul %3, %4, %cst_5 {dimension_numbers = #tpu.dot_dimension_numbers<[1], [0], [0], [1], [0, 0, 1, 1], [], []>} : vector<2x32xf32>, vector<32x2xf32>, vector<2x2xf32> -> vector<2x2xf32>
    %cst_6 = arith.constant 0.000000e+00 : f32
    %6 = vector.broadcast %cst_6 : f32 to vector<2x2xf32>
    %7 = arith.maximumf %5, %6 : vector<2x2xf32>
    %c0_7 = arith.constant 0 : index
    %c0_8 = arith.constant 0 : index
    %8 = vector.load %arg3[%c0_7, %c0_8] : memref<2x32xf32, #tpu.memory_space<vmem>>, vector<2x32xf32>
    %cst_9 = arith.constant dense<0.000000e+00> : vector<2x32xf32>
    %9 = tpu.matmul %7, %8, %cst_9 {dimension_numbers = #tpu.dot_dimension_numbers<[1], [0], [0], [1], [0, 0, 1, 1], [], []>} : vector<2x2xf32>, vector<2x32xf32>, vector<2x32xf32> -> vector<2x32xf32>
    %10 = arith.negf %9 : vector<2x32xf32>
    %11 = math.exp %10 : vector<2x32xf32>
    %cst_10 = arith.constant 1.000000e+00 : f32
    %12 = vector.broadcast %cst_10 : f32 to vector<2x32xf32>
    %13 = arith.addf %12, %11 : vector<2x32xf32>
    %14 = arith.divf %12, %13 : vector<2x32xf32>
    %15 = vector.shape_cast %14 : vector<2x32xf32> to vector<2x32x1xf32>
    %16 = vector.broadcast %15 : vector<2x32x1xf32> to vector<2x32x256xf32>
    %17 = arith.mulf %0, %16 : vector<2x32x256xf32>
    %c0_11 = arith.constant 0 : index
    %c0_12 = arith.constant 0 : index
    %c0_13 = arith.constant 0 : index
    %18 = vector.load %arg4[%c0_11, %c0_12, %c0_13] : memref<2x32x256xf32, #tpu.memory_space<vmem>>, vector<2x32x256xf32>
    tpu.vector_store %arg4[%c0_11, %c0_12, %c0_13], %17 {strides = array<i32>} : memref<2x32x256xf32, #tpu.memory_space<vmem>>, vector<2x32x256xf32>,
    return
  }
  func.func @transform_0(%arg0: i32) -> (i32, i32, i32) {
    %c0_i32 = arith.constant 0 : i32
    %c0_i32_0 = arith.constant 0 : i32
    %c0_i32_1 = arith.constant 0 : i32
    return %arg0, %c0_i32, %c0_i32_0 : i32, i32, i32
  }
  func.func @transform_1(%arg0: i32) -> (i32, i32) {
    %c0_i32 = arith.constant 0 : i32
    %c0_i32_0 = arith.constant 0 : i32
    %c0_i32_1 = arith.constant 0 : i32
    return %c0_i32, %c0_i32_0 : i32, i32
  }
  func.func @transform_2(%arg0: i32) -> (i32, i32) {
    %c0_i32 = arith.constant 0 : i32
    %c0_i32_0 = arith.constant 0 : i32
    %c0_i32_1 = arith.constant 0 : i32
    return %c0_i32, %c0_i32_0 : i32, i32
  }
  func.func @transform_3(%arg0: i32) -> (i32, i32, i32) {
    %c0_i32 = arith.constant 0 : i32
    %c0_i32_0 = arith.constant 0 : i32
    %c0_i32_1 = arith.constant 0 : i32
    return %arg0, %c0_i32, %c0_i32_0 : i32, i32, i32
  }
}

</mosaic_0001>

<bundles_post_ra>
// kernel: tpu_custom_call.1
= control target key start
LH: loop header
LB: loop body
LE: loop exit
PB: predicated region body
PF: predicated region fallthrough
CT: control target
= control target key end

     0   :  { %8 = vsyncpa [#allocation3], 0  ;;  %s581_s0 = inlined_call_operand.hbm [shape: f32[2,32,256], index: 0, kind: input, shape index: {}]   ;;  %s582_s1 = inlined_call_operand.vmem [shape: f32[32,2], index: 1, kind: input, shape index: {}]   ;;  %s583_s2 = inlined_call_operand.vmem [shape: f32[2,32], index: 2, kind: input, shape index: {}]   ;;  %s584_s3 = inlined_call_operand.hbm [shape: f32[2,32,256], index: 3, kind: output, shape index: {}]  }
   0x1   :  { %9 = vsyncpa [#allocation4], 0  ;;  %s464_s12 = smov [#allocation2]  }
   0x2   :  { %s15_s13 = sshll.u32 %s464_s12, 4  ;;  %s16_s13 = int_to_ptr.vmem [resolvable:$true] %s15_s13 }
   0x3   :  { %s428_s14 = scalar_lea.vmem %s16_s13, 2048  ;;  %p433_p1 = scmp.lt.s32.totalorder %s16_s13, %s16_s13 }
   0x4   :  { %p429_p0 = scmp.ne.s32.totalorder %s16_s13, %s428_s14  ;;  %p434_p2 = scmp.lt.s32.totalorder %s428_s14, %s428_s14 }
   0x6   :  { %p435_p3 = por %p434_p2, %p433_p1 }
   0x8   :  { %p436_p4 = pnand %p435_p3, %p429_p0 }
   0xa   :  { %439 = shalt.err (!%p436_p4)
}
   0xb   :  { %s465_s15 = smov 256   ;;  %s466_s16 = smov 16  }
   0xc   :  { %21 = dma.hbm_to_vmem [thread:$0]  %s581_s0, 2048, %s16_s13, [#allocation3], %s465_s15, %s465_s15, %s466_s16  }
   0xd   :  { %460 = dma.done.wait [#allocation3], 2048  }
   0xe   :  { %461 = vsyncadd [#allocation3], 4294965248  ;;  %v496_v0 = vld [vmem:[#allocation2 + $0x40] sm:$0xff]  ;;  %v498_v1 = vld [vmem:[#allocation2 + $0x48] sm:$0xff]  ;;  %v467_v24 = vmov 0.0   ;;  %vm468_vm0 = vmmov 0   ;;  %v89_v29 = vlaneseq }
   0xf   :  { %v500_v2 = vld [vmem:[#allocation2] sm:$0xff]  ;;  %v57_v3 = vadd.f32 %v498_v1, %v496_v0  ;;  %v504_v4 = vld [vmem:[#allocation2 + $0x8] sm:$0xff]  ;;  %v506_v5 = vld [vmem:[#allocation2 + $0x50] sm:$0xff]  ;;  %394 = vmatprep.subr.mxu0 %v467_v24  ;;  %405 = vmatprep.subr.mxu1 %v467_v24  ;;  %vm100_vm1 = vcmask 130112   ;;  %vm107_vm2 = vcmask 195712   ;;  %vm114_vm3 = vcmask 261312  }
  0x10   :  { %v508_v6 = vld [vmem:[#allocation2 + $0x58] sm:$0xff]  ;;  %v45_v7 = vadd.f32 %v504_v4, %v500_v2  ;;  %v512_v8 = vld [vmem:[#allocation2 + $0x10] sm:$0xff]  ;;  %v520_v12 = vld [vmem:[#allocation2 + $0x60] sm:$0xff]  ;;  %402 = vmatprep.mubr.msk.f32.mxu0 %vm468_vm0, %v467_v24  ;;  %407 = vmatprep.mubr.msk.f32.mxu1 %vm468_vm0, %v467_v24  ;;  %v90_v31 = vand.u32 127, %v89_v29  ;;  %v92_v36 = vshrl.u32 %v89_v29, 7  ;;  %vm135_vm4 = vcmask 1041409  }
  0x11   :  { %v514_v9 = vld [vmem:[#allocation2 + $0x18] sm:$0xff]  ;;  %58 = vadd.xlane.f32.xlu1 %v57_v3  ;;  %v60_v10 = vadd.f32 %v508_v6, %v506_v5  ;;  %v522_v13 = vld [vmem:[#allocation2 + $0x68] sm:$0xff]  ;;  %v524_v14 = vld [vmem:[#allocation2 + $0x20] sm:$0xff]  ;;  %vm137_vm5 = vcmask 261120   ;;  %vm216_vm6 = vcmask 1041408   ;;  %vm212_vm7 = vcmask 15360  }
  0x12   :  { %46 = vadd.xlane.f32.xlu0 %v45_v7  ;;  %v48_v11 = vadd.f32 %v514_v9, %v512_v8  ;;  %v526_v15 = vld [vmem:[#allocation2 + $0x28] sm:$0xff]  ;;  %v63_v16 = vadd.f32 %v522_v13, %v520_v12  ;;  %v532_v18 = vld [vmem:[#allocation2 + $0x70] sm:$0xff]  ;;  %v534_v19 = vld [vmem:[#allocation2 + $0x78] sm:$0xff]  ;;  %v95_v33 = vadd.s32 4294967288, %v90_v31  ;;  %v102_v35 = vadd.s32 4294967280, %v90_v31 }
  0x13   :  { %v51_v17 = vadd.f32 %v526_v15, %v524_v14  ;;  %v536_v20 = vld [vmem:[#allocation2 + $0x30] sm:$0xff]  ;;  %v538_v21 = vld [vmem:[#allocation2 + $0x38] sm:$0xff]  ;;  %v66_v22 = vadd.f32 %v534_v19, %v532_v18  ;;  %v78_v27 = vld [vmem:[%s582_s1 + $0x8] sm:$0xff]  ;;  %v109_v40 = vadd.s32 4294967272, %v90_v31  ;;  %v93_v44 = vsub.s32 %v90_v31, %v92_v36 }
  0x14   :  { %v54_v23 = vadd.f32 %v538_v21, %v536_v20  ;;  %v80_v25 = vld [vmem:[%s582_s1 + $0x18] sm:$0xff]  ;;  %v79_v26 = vld [vmem:[%s582_s1 + $0x10] sm:$0xff]  ;;  %v77_v28 = vld [vmem:[%s582_s1] sm:$0xff]  ;;  %v98_v38 = vsub.s32 %v95_v33, %v92_v36  ;;  %v105_v42 = vsub.s32 %v102_v35, %v92_v36  ;;  %v298_v31 = vsub.s32 0, %v92_v36 }
  0x15   :  { %61 = vadd.xlane.f32.xlu1 %v60_v10  ;;  %395 = vmatpush3.msra.mxu0 %v80_v25  ;;  %v112_v51 = vsub.s32 %v109_v40, %v92_v36 }
  0x16   :  { %49 = vadd.xlane.f32.xlu0 %v48_v11  ;;  %396 = vmatprep.subr.mxu0 %v467_v24 }
  0x17   :  { %397 = vmatpush3.msra.mxu0 %v79_v26 }
  0x18   :  { %398 = vmatprep.subr.mxu0 %v467_v24 }
  0x19   :  { %64 = vadd.xlane.f32.xlu1 %v63_v16  ;;  %399 = vmatpush3.msra.mxu0 %v78_v27 }
  0x1a   :  { %52 = vadd.xlane.f32.xlu0 %v51_v17  ;;  %400 = vmatprep.subr.mxu0 %v467_v24 }
  0x1b   :  { %401 = vmatpush3.msra.mxu0 %v77_v28 }
  0x1d   :  { %67 = vadd.xlane.f32.xlu1 %v66_v22  ;;  %v211_v22 = vld [vmem:[%s583_s2] sm:$0x3]  ;;  %s469_s2 = smov [#allocation5]  }
  0x1e   :  { %55 = vadd.xlane.f32.xlu0 %v54_v23  ;;  %406 = vmatpush3.msk.msra.mxu1 %vm216_vm6, %v211_v22  ;;  %s371_s27 = sshll.u32 %s469_s2, 4  ;;  %s372_s27 = int_to_ptr.vmem [resolvable:$true] %s371_s27 }
  0x1f   :  { %s440_s28 = scalar_lea.vmem %s372_s27, 2048  ;;  %p445_p6 = scmp.lt.s32.totalorder %s372_s27, %s372_s27 }
  0x20   :  { %p441_p5 = scmp.ne.s32.totalorder %s372_s27, %s440_s28  ;;  %p446_p7 = scmp.lt.s32.totalorder %s440_s28, %s440_s28 }
  0x22   :  { %p447_p8 = por %p446_p7, %p445_p6 }
  0x24   :  { %p448_p9 = pnand %p447_p8, %p441_p5 }
  0x9a   :  { %v59_v30 = vpop.xlane.xlu1 %58 }
  0x9b   :  { %v47_v32 = vpop.xlane.xlu0 %46  ;;  %v73_v45 = vmul.f32 0.00390625, %v59_v30 }
  0x9c   :  { %v69_v48 = vmul.f32 0.00390625, %v47_v32 }
  0x9d   :  { %v119_v55 = vrot.slane %v73_v45, %v93_v44 }
  0x9e   :  { %v62_v34 = vpop.xlane.xlu1 %61  ;;  %v94_v59 = vrot.slane %v69_v48, %v93_v44 }
  0x9f   :  { %v50_v37 = vpop.xlane.xlu0 %49  ;;  %v74_v39 = vmul.f32 0.00390625, %v62_v34  ;;  %v317_v34 = vsub.s32 1, %v92_v36 }
  0xa0   :  { %v70_v41 = vmul.f32 0.00390625, %v50_v37 }
  0xa1   :  { %v123_v50 = vrot.slane %v74_v39, %v98_v38 }
  0xa2   :  { %v65_v43 = vpop.xlane.xlu1 %64  ;;  %v99_v52 = vrot.slane %v70_v41, %v98_v38 }
  0xa3   :  { %v75_v46 = vmul.f32 0.00390625, %v65_v43  ;;  %v53_v47 = vpop.xlane.xlu0 %52  ;;  %v124_v61 = vsel %vm100_vm1, %v123_v50, %v119_v55 }
  0xa4   :  { %v71_v49 = vmul.f32 0.00390625, %v53_v47  ;;  %v101_v63 = vsel %vm100_vm1, %v99_v52, %v94_v59 }
  0xa5   :  { %v128_v53 = vrot.slane %v75_v46, %v105_v42 }
  0xa6   :  { %v68_v54 = vpop.xlane.xlu1 %67  ;;  %v106_v56 = vrot.slane %v71_v49, %v105_v42 }
  0xa7   :  { %v76_v57 = vmul.f32 0.00390625, %v68_v54  ;;  %v56_v58 = vpop.xlane.xlu0 %55  ;;  %v129_v3 = vsel %vm107_vm2, %v128_v53, %v124_v61 }
  0xa8   :  { %v72_v60 = vmul.f32 0.00390625, %v56_v58  ;;  %v108_v10 = vsel %vm107_vm2, %v106_v56, %v101_v63 }
  0xa9   :  { %v133_v62 = vrot.slane %v76_v57, %v112_v51 }
  0xaa   :  { %v113_v7 = vrot.slane %v72_v60, %v112_v51 }
  0xab   :  { %v134_v11 = vsel %vm114_vm3, %v133_v62, %v129_v3 }
  0xac   :  { %v115_v16 = vsel %vm114_vm3, %v113_v7, %v108_v10 }
  0xad   :  { %v136_v17 = vsel %vm135_vm4, %v134_v11, %v115_v16 }
  0xae   :  { %403 = vmatmul.mubr.msk.f32.vlgmr.msra.gmra.mxu0 %vm137_vm5, %v136_v17 }
 0x16e   :  { %v206_v23 = vpop.f32.mrf.mxu0 }
 0x16f   :  { %v210_v24 = vmax.f32 %v206_v23, 0.0 }
 0x170   :  { %v404_v25 = vpop.f32.mrf.mxu0 }
 0x171   :  { %408 = vmatmul.mubr.msk.f32.vlgmr.msra.gmra.mxu1 %vm212_vm7, %v210_v24 }
 0x231   :  { %v286_v26 = vpop.f32.mrf.mxu1 }
 0x232   :  { %v386_v27 = vmul.f32 -1.442695, %v286_v26 }
 0x233   :  { %v409_v28 = vpop.f32.mrf.mxu1 }
 0x234   :  { %416 = vpow2.f32 %v386_v27 }
 0x241   :  { %v417_v29 = vpop.eup %416 }
 0x242   :  { %v293_v30 = vadd.f32 1.0, %v417_v29 }
 0x244   :  { %418 = vrcp.f32 %v293_v30 }
 0x251   :  { %v419_v32 = vpop.eup %418 }
 0x252   :  { %v299_v33 = vrot.slane %v419_v32, %v298_v31  ;;  %v318_v35 = vrot.slane %v419_v32, %v317_v34 }
 0x254   :  { %305 = vbcast.lane.b32.xlu1 %v299_v33, 264  ;;  %301 = vbcast.lane.b32.xlu0 %v299_v33, 256 }
 0x258   :  { %309 = vbcast.lane.b32.xlu1 %v299_v33, 272  ;;  %320 = vbcast.lane.b32.xlu0 %v318_v35, 256 }
 0x25c   :  { %313 = vbcast.lane.b32.xlu1 %v299_v33, 280  ;;  %328 = vbcast.lane.b32.xlu0 %v318_v35, 272 }
 0x260   :  { %324 = vbcast.lane.b32.xlu1 %v318_v35, 264 }
 0x264   :  { %332 = vbcast.lane.b32.xlu1 %v318_v35, 280 }
 0x2c6   :  { %v306_v37 = vpop.permute.xlu1 %305  ;;  %v302_v38 = vpop.permute.xlu0 %301 }
 0x2c7   :  { %v336_v39 = vmul.f32 %v306_v37, %v512_v8  ;;  %v337_v40 = vmul.f32 %v306_v37, %v514_v9  ;;  %v334_v41 = vmul.f32 %v302_v38, %v500_v2  ;;  %v335_v42 = vmul.f32 %v302_v38, %v504_v4 }
 0x2c9   :  { %352 = vst [vmem:[#allocation5 + $0x10] sm:$0xff] %v336_v39  ;;  %353 = vst [vmem:[#allocation5 + $0x18] sm:$0xff] %v337_v40 }
 0x2ca   :  { %350 = vst [vmem:[#allocation5] sm:$0xff] %v334_v41  ;;  %351 = vst [vmem:[#allocation5 + $0x8] sm:$0xff] %v335_v42  ;;  %v310_v36 = vpop.permute.xlu1 %309  ;;  %v321_v43 = vpop.permute.xlu0 %320 }
 0x2cb   :  { %v338_v44 = vmul.f32 %v310_v36, %v524_v14  ;;  %v339_v45 = vmul.f32 %v310_v36, %v526_v15  ;;  %v342_v46 = vmul.f32 %v321_v43, %v496_v0  ;;  %v343_v8 = vmul.f32 %v321_v43, %v498_v1 }
 0x2cd   :  { %354 = vst [vmem:[#allocation5 + $0x20] sm:$0xff] %v338_v44  ;;  %355 = vst [vmem:[#allocation5 + $0x28] sm:$0xff] %v339_v45 }
 0x2ce   :  { %358 = vst [vmem:[#allocation5 + $0x40] sm:$0xff] %v342_v46  ;;  %359 = vst [vmem:[#allocation5 + $0x48] sm:$0xff] %v343_v8  ;;  %v314_v2 = vpop.permute.xlu1 %313  ;;  %v329_v4 = vpop.permute.xlu0 %328 }
 0x2cf   :  { %v340_v9 = vmul.f32 %v314_v2, %v536_v20  ;;  %v341_v47 = vmul.f32 %v314_v2, %v538_v21  ;;  %v346_v48 = vmul.f32 %v329_v4, %v520_v12  ;;  %v347_v14 = vmul.f32 %v329_v4, %v522_v13 }
 0x2d1   :  { %356 = vst [vmem:[#allocation5 + $0x30] sm:$0xff] %v340_v9  ;;  %357 = vst [vmem:[#allocation5 + $0x38] sm:$0xff] %v341_v47 }
 0x2d2   :  { %362 = vst [vmem:[#allocation5 + $0x60] sm:$0xff] %v346_v48  ;;  %363 = vst [vmem:[#allocation5 + $0x68] sm:$0xff] %v347_v14  ;;  %v325_v0 = vpop.permute.xlu1 %324 }
 0x2d3   :  { %v344_v1 = vmul.f32 %v325_v0, %v506_v5  ;;  %v345_v15 = vmul.f32 %v325_v0, %v508_v6 }
 0x2d5   :  { %360 = vst [vmem:[#allocation5 + $0x50] sm:$0xff] %v344_v1  ;;  %361 = vst [vmem:[#allocation5 + $0x58] sm:$0xff] %v345_v15 }
 0x2d6   :  { %v333_v20 = vpop.permute.xlu1 %332 }
 0x2d7   :  { %v348_v21 = vmul.f32 %v333_v20, %v532_v18  ;;  %v349_v12 = vmul.f32 %v333_v20, %v534_v19 }
 0x2d9   :  { %364 = vst [vmem:[#allocation5 + $0x70] sm:$0xff] %v348_v21  ;;  %365 = vst [vmem:[#allocation5 + $0x78] sm:$0xff] %v349_v12 }
 0x2da   :  { %451 = shalt.err (!%p448_p9)
}
 0x2db   :  { %377 = dma.vmem_to_hbm [thread:$0]  %s372_s27, 2048, %s584_s3, [#allocation4], %s465_s15, %s465_s15, %s466_s16  }
 0x2dc   :  { %462 = dma.done.wait [#allocation4], 2048  }
 0x2dd   :  { %463 = vsyncadd [#allocation4], 4294965248 }
 0x2de   :  { %381 = vsyncpa [#allocation3], 1 }
 0x2df   :  { %382 = vsyncpa [#allocation4], 1 }

// kernel: tpu_custom_call.1
= control target key start
LH: loop header
LB: loop body
LE: loop exit
PB: predicated region body
PF: predicated region fallthrough
CT: control target
= control target key end

     0   :  { %8 = vsyncpa [#allocation3], 0  ;;  %s581_s0 = inlined_call_operand.hbm [shape: f32[2,32,256], index: 0, kind: input, shape index: {}]   ;;  %s582_s1 = inlined_call_operand.vmem [shape: f32[32,2], index: 1, kind: input, shape index: {}]   ;;  %s583_s2 = inlined_call_operand.vmem [shape: f32[2,32], index: 2, kind: input, shape index: {}]   ;;  %s584_s3 = inlined_call_operand.hbm [shape: f32[2,32,256], index: 3, kind: output, shape index: {}]  }
   0x1   :  { %9 = vsyncpa [#allocation4], 0  ;;  %s464_s12 = smov [#allocation2]  }
   0x2   :  { %s15_s13 = sshll.u32 %s464_s12, 4  ;;  %s16_s13 = int_to_ptr.vmem [resolvable:$true] %s15_s13 }
   0x3   :  { %s428_s14 = scalar_lea.vmem %s16_s13, 2048  ;;  %p433_p1 = scmp.lt.s32.totalorder %s16_s13, %s16_s13 }
   0x4   :  { %p429_p0 = scmp.ne.s32.totalorder %s16_s13, %s428_s14  ;;  %p434_p2 = scmp.lt.s32.totalorder %s428_s14, %s428_s14 }
   0x6   :  { %p435_p3 = por %p434_p2, %p433_p1 }
   0x8   :  { %p436_p4 = pnand %p435_p3, %p429_p0 }
   0xa   :  { %439 = shalt.err (!%p436_p4)
}
   0xb   :  { %s465_s15 = smov 256   ;;  %s466_s16 = smov 16  }
   0xc   :  { %21 = dma.hbm_to_vmem [thread:$0]  %s581_s0, 2048, %s16_s13, [#allocation3], %s465_s15, %s465_s15, %s466_s16  }
   0xd   :  { %460 = dma.done.wait [#allocation3], 2048  }
   0xe   :  { %461 = vsyncadd [#allocation3], 4294965248  ;;  %v496_v0 = vld [vmem:[#allocation2 + $0x40] sm:$0xff]  ;;  %v498_v1 = vld [vmem:[#allocation2 + $0x48] sm:$0xff]  ;;  %v467_v24 = vmov 0.0   ;;  %vm468_vm0 = vmmov 0   ;;  %v89_v29 = vlaneseq }
   0xf   :  { %v500_v2 = vld [vmem:[#allocation2] sm:$0xff]  ;;  %v57_v3 = vadd.f32 %v498_v1, %v496_v0  ;;  %v504_v4 = vld [vmem:[#allocation2 + $0x8] sm:$0xff]  ;;  %v506_v5 = vld [vmem:[#allocation2 + $0x50] sm:$0xff]  ;;  %394 = vmatprep.subr.mxu0 %v467_v24  ;;  %405 = vmatprep.subr.mxu1 %v467_v24  ;;  %vm100_vm1 = vcmask 130112   ;;  %vm107_vm2 = vcmask 195712   ;;  %vm114_vm3 = vcmask 261312  }
  0x10   :  { %v508_v6 = vld [vmem:[#allocation2 + $0x58] sm:$0xff]  ;;  %v45_v7 = vadd.f32 %v504_v4, %v500_v2  ;;  %v512_v8 = vld [vmem:[#allocation2 + $0x10] sm:$0xff]  ;;  %v520_v12 = vld [vmem:[#allocation2 + $0x60] sm:$0xff]  ;;  %402 = vmatprep.mubr.msk.f32.mxu0 %vm468_vm0, %v467_v24  ;;  %407 = vmatprep.mubr.msk.f32.mxu1 %vm468_vm0, %v467_v24  ;;  %v90_v31 = vand.u32 127, %v89_v29  ;;  %v92_v36 = vshrl.u32 %v89_v29, 7  ;;  %vm135_vm4 = vcmask 1041409  }
  0x11   :  { %v514_v9 = vld [vmem:[#allocation2 + $0x18] sm:$0xff]  ;;  %58 = vadd.xlane.f32.xlu1 %v57_v3  ;;  %v60_v10 = vadd.f32 %v508_v6, %v506_v5  ;;  %v522_v13 = vld [vmem:[#allocation2 + $0x68] sm:$0xff]  ;;  %v524_v14 = vld [vmem:[#allocation2 + $0x20] sm:$0xff]  ;;  %vm137_vm5 = vcmask 261120   ;;  %vm216_vm6 = vcmask 1041408   ;;  %vm212_vm7 = vcmask 15360  }
  0x12   :  { %46 = vadd.xlane.f32.xlu0 %v45_v7  ;;  %v48_v11 = vadd.f32 %v514_v9, %v512_v8  ;;  %v526_v15 = vld [vmem:[#allocation2 + $0x28] sm:$0xff]  ;;  %v63_v16 = vadd.f32 %v522_v13, %v520_v12  ;;  %v532_v18 = vld [vmem:[#allocation2 + $0x70] sm:$0xff]  ;;  %v534_v19 = vld [vmem:[#allocation2 + $0x78] sm:$0xff]  ;;  %v95_v33 = vadd.s32 4294967288, %v90_v31  ;;  %v102_v35 = vadd.s32 4294967280, %v90_v31 }
  0x13   :  { %v51_v17 = vadd.f32 %v526_v15, %v524_v14  ;;  %v536_v20 = vld [vmem:[#allocation2 + $0x30] sm:$0xff]  ;;  %v538_v21 = vld [vmem:[#allocation2 + $0x38] sm:$0xff]  ;;  %v66_v22 = vadd.f32 %v534_v19, %v532_v18  ;;  %v78_v27 = vld [vmem:[%s582_s1 + $0x8] sm:$0xff]  ;;  %v109_v40 = vadd.s32 4294967272, %v90_v31  ;;  %v93_v44 = vsub.s32 %v90_v31, %v92_v36 }
  0x14   :  { %v54_v23 = vadd.f32 %v538_v21, %v536_v20  ;;  %v80_v25 = vld [vmem:[%s582_s1 + $0x18] sm:$0xff]  ;;  %v79_v26 = vld [vmem:[%s582_s1 + $0x10] sm:$0xff]  ;;  %v77_v28 = vld [vmem:[%s582_s1] sm:$0xff]  ;;  %v98_v38 = vsub.s32 %v95_v33, %v92_v36  ;;  %v105_v42 = vsub.s32 %v102_v35, %v92_v36  ;;  %v298_v31 = vsub.s32 0, %v92_v36 }
  0x15   :  { %61 = vadd.xlane.f32.xlu1 %v60_v10  ;;  %395 = vmatpush3.msra.mxu0 %v80_v25  ;;  %v112_v51 = vsub.s32 %v109_v40, %v92_v36 }
  0x16   :  { %49 = vadd.xlane.f32.xlu0 %v48_v11  ;;  %396 = vmatprep.subr.mxu0 %v467_v24 }
  0x17   :  { %397 = vmatpush3.msra.mxu0 %v79_v26 }
  0x18   :  { %398 = vmatprep.subr.mxu0 %v467_v24 }
  0x19   :  { %64 = vadd.xlane.f32.xlu1 %v63_v16  ;;  %399 = vmatpush3.msra.mxu0 %v78_v27 }
  0x1a   :  { %52 = vadd.xlane.f32.xlu0 %v51_v17  ;;  %400 = vmatprep.subr.mxu0 %v467_v24 }
  0x1b   :  { %401 = vmatpush3.msra.mxu0 %v77_v28 }
  0x1d   :  { %67 = vadd.xlane.f32.xlu1 %v66_v22  ;;  %v211_v22 = vld [vmem:[%s583_s2] sm:$0x3]  ;;  %s469_s2 = smov [#allocation5]  }
  0x1e   :  { %55 = vadd.xlane.f32.xlu0 %v54_v23  ;;  %406 = vmatpush3.msk.msra.mxu1 %vm216_vm6, %v211_v22  ;;  %s371_s27 = sshll.u32 %s469_s2, 4  ;;  %s372_s27 = int_to_ptr.vmem [resolvable:$true] %s371_s27 }
  0x1f   :  { %s440_s28 = scalar_lea.vmem %s372_s27, 2048  ;;  %p445_p6 = scmp.lt.s32.totalorder %s372_s27, %s372_s27 }
  0x20   :  { %p441_p5 = scmp.ne.s32.totalorder %s372_s27, %s440_s28  ;;  %p446_p7 = scmp.lt.s32.totalorder %s440_s28, %s440_s28 }
  0x22   :  { %p447_p8 = por %p446_p7, %p445_p6 }
  0x24   :  { %p448_p9 = pnand %p447_p8, %p441_p5 }
  0x9a   :  { %v59_v30 = vpop.xlane.xlu1 %58 }
  0x9b   :  { %v47_v32 = vpop.xlane.xlu0 %46  ;;  %v73_v45 = vmul.f32 0.00390625, %v59_v30 }
  0x9c   :  { %v69_v48 = vmul.f32 0.00390625, %v47_v32 }
  0x9d   :  { %v119_v55 = vrot.slane %v73_v45, %v93_v44 }
  0x9e   :  { %v62_v34 = vpop.xlane.xlu1 %61  ;;  %v94_v59 = vrot.slane %v69_v48, %v93_v44 }
  0x9f   :  { %v50_v37 = vpop.xlane.xlu0 %49  ;;  %v74_v39 = vmul.f32 0.00390625, %v62_v34  ;;  %v317_v34 = vsub.s32 1, %v92_v36 }
  0xa0   :  { %v70_v41 = vmul.f32 0.00390625, %v50_v37 }
  0xa1   :  { %v123_v50 = vrot.slane %v74_v39, %v98_v38 }
  0xa2   :  { %v65_v43 = vpop.xlane.xlu1 %64  ;;  %v99_v52 = vrot.slane %v70_v41, %v98_v38 }
  0xa3   :  { %v75_v46 = vmul.f32 0.00390625, %v65_v43  ;;  %v53_v47 = vpop.xlane.xlu0 %52  ;;  %v124_v61 = vsel %vm100_vm1, %v123_v50, %v119_v55 }
  0xa4   :  { %v71_v49 = vmul.f32 0.00390625, %v53_v47  ;;  %v101_v63 = vsel %vm100_vm1, %v99_v52, %v94_v59 }
  0xa5   :  { %v128_v53 = vrot.slane %v75_v46, %v105_v42 }
  0xa6   :  { %v68_v54 = vpop.xlane.xlu1 %67  ;;  %v106_v56 = vrot.slane %v71_v49, %v105_v42 }
  0xa7   :  { %v76_v57 = vmul.f32 0.00390625, %v68_v54  ;;  %v56_v58 = vpop.xlane.xlu0 %55  ;;  %v129_v3 = vsel %vm107_vm2, %v128_v53, %v124_v61 }
  0xa8   :  { %v72_v60 = vmul.f32 0.00390625, %v56_v58  ;;  %v108_v10 = vsel %vm107_vm2, %v106_v56, %v101_v63 }
  0xa9   :  { %v133_v62 = vrot.slane %v76_v57, %v112_v51 }
  0xaa   :  { %v113_v7 = vrot.slane %v72_v60, %v112_v51 }
  0xab   :  { %v134_v11 = vsel %vm114_vm3, %v133_v62, %v129_v3 }
  0xac   :  { %v115_v16 = vsel %vm114_vm3, %v113_v7, %v108_v10 }
  0xad   :  { %v136_v17 = vsel %vm135_vm4, %v134_v11, %v115_v16 }
  0xae   :  { %403 = vmatmul.mubr.msk.f32.vlgmr.msra.gmra.mxu0 %vm137_vm5, %v136_v17 }
 0x16e   :  { %v206_v23 = vpop.f32.mrf.mxu0 }
 0x16f   :  { %v210_v24 = vmax.f32 %v206_v23, 0.0 }
 0x170   :  { %v404_v25 = vpop.f32.mrf.mxu0 }
 0x171   :  { %408 = vmatmul.mubr.msk.f32.vlgmr.msra.gmra.mxu1 %vm212_vm7, %v210_v24 }
 0x231   :  { %v286_v26 = vpop.f32.mrf.mxu1 }
 0x232   :  { %v386_v27 = vmul.f32 -1.442695, %v286_v26 }
 0x233   :  { %v409_v28 = vpop.f32.mrf.mxu1 }
 0x234   :  { %416 = vpow2.f32 %v386_v27 }
 0x241   :  { %v417_v29 = vpop.eup %416 }
 0x242   :  { %v293_v30 = vadd.f32 1.0, %v417_v29 }
 0x244   :  { %418 = vrcp.f32 %v293_v30 }
 0x251   :  { %v419_v32 = vpop.eup %418 }
 0x252   :  { %v299_v33 = vrot.slane %v419_v32, %v298_v31  ;;  %v318_v35 = vrot.slane %v419_v32, %v317_v34 }
 0x254   :  { %305 = vbcast.lane.b32.xlu1 %v299_v33, 264  ;;  %301 = vbcast.lane.b32.xlu0 %v299_v33, 256 }
 0x258   :  { %309 = vbcast.lane.b32.xlu1 %v299_v33, 272  ;;  %320 = vbcast.lane.b32.xlu0 %v318_v35, 256 }
 0x25c   :  { %313 = vbcast.lane.b32.xlu1 %v299_v33, 280  ;;  %328 = vbcast.lane.b32.xlu0 %v318_v35, 272 }
 0x260   :  { %324 = vbcast.lane.b32.xlu1 %v318_v35, 264 }
 0x264   :  { %332 = vbcast.lane.b32.xlu1 %v318_v35, 280 }
 0x2c6   :  { %v306_v37 = vpop.permute.xlu1 %305  ;;  %v302_v38 = vpop.permute.xlu0 %301 }
 0x2c7   :  { %v336_v39 = vmul.f32 %v306_v37, %v512_v8  ;;  %v337_v40 = vmul.f32 %v306_v37, %v514_v9  ;;  %v334_v41 = vmul.f32 %v302_v38, %v500_v2  ;;  %v335_v42 = vmul.f32 %v302_v38, %v504_v4 }
 0x2c9   :  { %352 = vst [vmem:[#allocation5 + $0x10] sm:$0xff] %v336_v39  ;;  %353 = vst [vmem:[#allocation5 + $0x18] sm:$0xff] %v337_v40 }
 0x2ca   :  { %350 = vst [vmem:[#allocation5] sm:$0xff] %v334_v41  ;;  %351 = vst [vmem:[#allocation5 + $0x8] sm:$0xff] %v335_v42  ;;  %v310_v36 = vpop.permute.xlu1 %309  ;;  %v321_v43 = vpop.permute.xlu0 %320 }
 0x2cb   :  { %v338_v44 = vmul.f32 %v310_v36, %v524_v14  ;;  %v339_v45 = vmul.f32 %v310_v36, %v526_v15  ;;  %v342_v46 = vmul.f32 %v321_v43, %v496_v0  ;;  %v343_v8 = vmul.f32 %v321_v43, %v498_v1 }
 0x2cd   :  { %354 = vst [vmem:[#allocation5 + $0x20] sm:$0xff] %v338_v44  ;;  %355 = vst [vmem:[#allocation5 + $0x28] sm:$0xff] %v339_v45 }
 0x2ce   :  { %358 = vst [vmem:[#allocation5 + $0x40] sm:$0xff] %v342_v46  ;;  %359 = vst [vmem:[#allocation5 + $0x48] sm:$0xff] %v343_v8  ;;  %v314_v2 = vpop.permute.xlu1 %313  ;;  %v329_v4 = vpop.permute.xlu0 %328 }
 0x2cf   :  { %v340_v9 = vmul.f32 %v314_v2, %v536_v20  ;;  %v341_v47 = vmul.f32 %v314_v2, %v538_v21  ;;  %v346_v48 = vmul.f32 %v329_v4, %v520_v12  ;;  %v347_v14 = vmul.f32 %v329_v4, %v522_v13 }
 0x2d1   :  { %356 = vst [vmem:[#allocation5 + $0x30] sm:$0xff] %v340_v9  ;;  %357 = vst [vmem:[#allocation5 + $0x38] sm:$0xff] %v341_v47 }
 0x2d2   :  { %362 = vst [vmem:[#allocation5 + $0x60] sm:$0xff] %v346_v48  ;;  %363 = vst [vmem:[#allocation5 + $0x68] sm:$0xff] %v347_v14  ;;  %v325_v0 = vpop.permute.xlu1 %324 }
 0x2d3   :  { %v344_v1 = vmul.f32 %v325_v0, %v506_v5  ;;  %v345_v15 = vmul.f32 %v325_v0, %v508_v6 }
 0x2d5   :  { %360 = vst [vmem:[#allocation5 + $0x50] sm:$0xff] %v344_v1  ;;  %361 = vst [vmem:[#allocation5 + $0x58] sm:$0xff] %v345_v15 }
 0x2d6   :  { %v333_v20 = vpop.permute.xlu1 %332 }
 0x2d7   :  { %v348_v21 = vmul.f32 %v333_v20, %v532_v18  ;;  %v349_v12 = vmul.f32 %v333_v20, %v534_v19 }
 0x2d9   :  { %364 = vst [vmem:[#allocation5 + $0x70] sm:$0xff] %v348_v21  ;;  %365 = vst [vmem:[#allocation5 + $0x78] sm:$0xff] %v349_v12 }
 0x2da   :  { %451 = shalt.err (!%p448_p9)
}
 0x2db   :  { %377 = dma.vmem_to_hbm [thread:$0]  %s372_s27, 2048, %s584_s3, [#allocation4], %s465_s15, %s465_s15, %s466_s16  }
 0x2dc   :  { %462 = dma.done.wait [#allocation4], 2048  }
 0x2dd   :  { %463 = vsyncadd [#allocation4], 4294965248 }
 0x2de   :  { %381 = vsyncpa [#allocation3], 1 }
 0x2df   :  { %382 = vsyncpa [#allocation4], 1 }

</bundles_post_ra>
